<compile_context>
chip_gen: v7x
topology: tpu7x:2x2x1
jax: 0.10.0
libtpu: 0.0.40
codegen_flags: <defaults>
</compile_context>

<pallas_src>
import functools

import jax
import jax.numpy as jnp
from jax.experimental import pallas as pl
from jax.experimental.pallas import tpu as pltpu


def _linear_kernel(x_ref, w_ref, b_ref, o_ref):
    # One (tm, H) tile of packed rows x one (H, tn) weight column block + bias.
    # Cast activations to the weight dtype in VMEM (no-op if they already
    # match), accumulate in f32 on the MXU, f32 bias epilogue on the VPU.
    # NOTE: every output row depends only on its own x row, so the ragged last
    # row tile (padded reads / masked writeback) is safe.  Do not add a
    # row-coupled epilogue (e.g. a reduction over the tile) without masking.
    x = x_ref[...].astype(w_ref.dtype)
    acc = jnp.dot(x, w_ref[...], preferred_element_type=jnp.float32)
    o_ref[...] = (acc + b_ref[...]).astype(o_ref.dtype)


def _round_up(x, m):
    return ((x + m - 1) // m) * m


def _bucket_rows(n):
    """Pad packed row count to a small bucket set to bound jit recompiles."""
    if n <= 8:
        return 8
    if n <= 1024:
        return 1 << (n - 1).bit_length()      # powers of two up to 1024
    return _round_up(n, 512)                  # then 512-row granularity


def _tpu_vmem_capacity_bytes():
    try:
        cap = getattr(pltpu.get_tpu_info(), "vmem_capacity_bytes", None)
        if cap:
            return int(cap)
    except Exception:
        pass
    return 64 << 20  # conservative: v7x per-TC capacity


@functools.partial(jax.jit, static_argnames=("tile_m_max",))
def _packed_linear(x, w, b, *, tile_m_max=1024):
    """y = x @ w + b with a row/column tiled Pallas kernel.

    x: [N, H] packed-sequence data (f32 or bf16)
    w: [H, O] weight in compute dtype (bf16 by default, f32 for exact parity)
    b: [1, O] f32 bias
    -> y: [N, O] f32
    """
    n, h = x.shape
    h_w, o = w.shape
    assert h_w == h

    x_bytes = jnp.dtype(x.dtype).itemsize
    w_bytes = jnp.dtype(w.dtype).itemsize
    out_bytes = jnp.dtype(jnp.float32).itemsize

    cap = _tpu_vmem_capacity_bytes()
    budget = int(cap * 0.6)  # ~38 MiB on v7x (64 MiB/TC), ~76 MiB on v5e/v6e

    # Column tiling only when the resident weight slab is a large VMEM fraction
    # (keeps stores lane-dense; 256-wide blocks fill the 2x256^2 MXU).
    tn = o
    if o % 128 == 0 and 2 * h * o * w_bytes > budget // 3:
        tn = 256 if o % 256 == 0 else 128
    grid_n = o // tn

    # Double-buffered footprint: weight + bias (resident, worst-case 2 bufs)
    # plus per-row x and output tiles.  Shrink tm to fit the budget.
    resident = 2 * (h * tn * w_bytes + tn * out_bytes)
    per_row = 2 * (h * x_bytes + tn * out_bytes)
    avail = max(budget - resident, 8 * per_row)
    tm = min(tile_m_max, max(8, (avail // per_row) // 8 * 8), _round_up(n, 8))
    grid_m = pl.cdiv(n, tm)

    need = resident + tm * per_row
    vmem_limit = int(min(cap - (8 << 20), max(need + (4 << 20), 16 << 20)))

    cost = pl.CostEstimate(
        flops=2 * n * h * o,
        transcendentals=0,
        bytes_accessed=n * h * x_bytes + h * o * w_bytes
        + o * out_bytes + n * o * out_bytes,
    )

    return pl.pallas_call(
        _linear_kernel,
        out_shape=jax.ShapeDtypeStruct((n, o), jnp.float32),
        grid_spec=pltpu.PrefetchScalarGridSpec(
            num_scalar_prefetch=0,
            grid=(grid_m, grid_n),
            in_specs=[
                pl.BlockSpec((tm, h), lambda i, j: (i, 0)),   # packed-row tile
                pl.BlockSpec((h, tn), lambda i, j: (0, j)),   # resident weight cols
                pl.BlockSpec((1, tn), lambda i, j: (0, j)),   # bias cols
            ],
            out_specs=pl.BlockSpec((tm, tn), lambda i, j: (i, j)),
        ),
        compiler_params=pltpu.CompilerParams(
            dimension_semantics=("parallel", "parallel"),
            vmem_limit_bytes=vmem_limit,
        ),
        cost_estimate=cost,
    )(x, w, b)


class SequenceWisePallas:
    """JAX/Pallas analogue of SequenceWise(nn.Linear(in_features, out_features)).

    A PackedSequence is represented as the tuple (data, batch_sizes); forward
    applies the inner Linear to `data` and passes `batch_sizes` through
    unchanged, mirroring the PyTorch module.

    Precision: `compute_dtype=jnp.bfloat16` (default) stores the weight in bf16
    and casts activations to bf16 in VMEM (f32 accumulation, f32 bias/output) —
    ~1e-3-level relative deviation from PyTorch's fp32 nn.Linear in exchange for
    roughly half the binding HBM read on v6e/v7x.  Pass
    `compute_dtype=jnp.float32` for exact fp32-parity math.
    """

    def __init__(self, in_features, out_features, key, *, compute_dtype=jnp.bfloat16):
        kw, kb = jax.random.split(key)
        bound = 1.0 / (in_features ** 0.5)
        # PyTorch stores weight as [O, H]; keep a transposed [H, O] copy in the
        # compute dtype.  No output-column padding: the kernel writes exactly O
        # lanes (masked stores when O % 128 != 0, lane-dense otherwise).
        w_torch_layout = jax.random.uniform(
            kw, (out_features, in_features), jnp.float32, -bound, bound)
        bias = jax.random.uniform(kb, (out_features,), jnp.float32, -bound, bound)

        self.in_features = in_features
        self.out_features = out_features
        self.compute_dtype = compute_dtype
        self.w = jnp.transpose(w_torch_layout).astype(compute_dtype)  # [H, O]
        self.b = bias[None, :].astype(jnp.float32)                    # [1, O]

    def __call__(self, packed):
        data, batch_sizes = packed
        n = data.shape[0]
        # Bucket the ragged packed row count so jit compiles are bounded across
        # calls; the zero-padded rows are dropped again below.
        n_pad = _bucket_rows(n)
        if n_pad != n:
            data = jnp.pad(data, ((0, n_pad - n), (0, 0)))
        y = _packed_linear(data, self.w, self.b)
        if n_pad != n:
            y = y[:n]
        return (y, batch_sizes)


if __name__ == "__main__":
    key = jax.random.PRNGKey(0)
    k_x, k_mod = jax.random.split(key)

    # Small PackedSequence-like input: batch=2 with lengths [8, 6].
    #   batch_sizes = [2, 2, 2, 2, 2, 2, 1, 1]  ->  total packed rows = 14.
    seq_lens = [8, 6]
    batch_sizes = jnp.array(
        [sum(1 for L in seq_lens if L > t) for t in range(max(seq_lens))],
        dtype=jnp.int32)
    n_total = int(batch_sizes.sum())          # 14
    hidden = 32
    out_features = 48

    x_data = jax.random.normal(k_x, (n_total, hidden), jnp.float32)
    packed_in = (x_data, batch_sizes)

    # Default bf16-operand / f32-accumulation path.
    module = SequenceWisePallas(hidden, out_features, k_mod)
    out_data, out_batch_sizes = module(packed_in)
    out_data = jax.block_until_ready(out_data)

    assert out_data.shape == (n_total, out_features)
    assert out_data.dtype == jnp.float32
    assert bool(jnp.all(out_batch_sizes == batch_sizes))

    # (1) Tight check against a reference using the same bf16 operand cast /
    #     f32 accumulation (validates the kernel itself).
    ref_bf16 = jnp.dot(x_data.astype(jnp.bfloat16), module.w,
                       preferred_element_type=jnp.float32) + module.b
    assert jnp.allclose(out_data, ref_bf16, atol=1e-3, rtol=1e-3)

    # (2) Documented precision deviation vs. full-fp32 nn.Linear math: bf16
    #     operands introduce ~1e-3-level relative error for this H; checked
    #     against an fp32 HIGHEST-precision reference with a loose tolerance.
    ref_f32 = jnp.dot(x_data, module.w.astype(jnp.float32),
                      precision=jax.lax.Precision.HIGHEST) + module.b
    assert jnp.allclose(out_data, ref_f32, atol=5e-2, rtol=5e-2)

    # (3) Exercise the configurable fp32-parity path as well.
    module_f32 = SequenceWisePallas(hidden, out_features, k_mod,
                                    compute_dtype=jnp.float32)
    out_f32, _ = module_f32(packed_in)
    out_f32 = jax.block_until_ready(out_f32)
    ref_f32_exact = jnp.dot(x_data, module_f32.w,
                            precision=jax.lax.Precision.HIGHEST) + module_f32.b
    assert jnp.allclose(out_f32, ref_f32_exact, atol=1e-2, rtol=1e-2)

    print("KERNEL_OK")
</pallas_src>

<mosaic_0001>
module attributes {stable_mosaic.version = 11 : i64} {
  func.func @_linear_kernel(%arg0: i32, %arg1: i32, %arg2: memref<16x32xf32, #tpu.memory_space<vmem>>, %arg3: memref<32x48xbf16, #tpu.memory_space<vmem>>, %arg4: memref<1x48xf32, #tpu.memory_space<vmem>>, %arg5: memref<16x48xf32, #tpu.memory_space<vmem>>) attributes {dimension_semantics = [#tpu.dimension_semantics<parallel>, #tpu.dimension_semantics<parallel>], iteration_bounds = array<i64: 1, 1>, scalar_prefetch = 0 : i64, scratch_operands = 0 : i64, tpu.core_type = #tpu.core_type<tc>, window_params = [{transform_indices = @transform_0, window_bounds = array<i64: 16, 32>}, {transform_indices = @transform_1, window_bounds = array<i64: 32, 48>}, {transform_indices = @transform_2, window_bounds = array<i64: 1, 48>}, {transform_indices = @transform_3, window_bounds = array<i64: 16, 48>}]} {
    %c0 = arith.constant 0 : index
    %c0_0 = arith.constant 0 : index
    %0 = vector.load %arg2[%c0, %c0_0] : memref<16x32xf32, #tpu.memory_space<vmem>>, vector<16x32xf32>
    %1 = arith.truncf %0 : vector<16x32xf32> to vector<16x32xbf16>
    %c0_1 = arith.constant 0 : index
    %c0_2 = arith.constant 0 : index
    %2 = vector.load %arg3[%c0_1, %c0_2] : memref<32x48xbf16, #tpu.memory_space<vmem>>, vector<32x48xbf16>
    %cst = arith.constant dense<0.000000e+00> : vector<16x48xf32>
    %3 = tpu.matmul %1, %2, %cst {dimension_numbers = #tpu.dot_dimension_numbers<[1], [0], [0], [1], [0, 0, 1, 1], [], []>} : vector<16x32xbf16>, vector<32x48xbf16>, vector<16x48xf32> -> vector<16x48xf32>
    %c0_3 = arith.constant 0 : index
    %c0_4 = arith.constant 0 : index
    %4 = vector.load %arg4[%c0_3, %c0_4] : memref<1x48xf32, #tpu.memory_space<vmem>>, vector<1x48xf32>
    %5 = vector.broadcast %4 : vector<1x48xf32> to vector<16x48xf32>
    %6 = arith.addf %3, %5 : vector<16x48xf32>
    %c0_5 = arith.constant 0 : index
    %c0_6 = arith.constant 0 : index
    %7 = vector.load %arg5[%c0_5, %c0_6] : memref<16x48xf32, #tpu.memory_space<vmem>>, vector<16x48xf32>
    tpu.vector_store %arg5[%c0_5, %c0_6], %6 {strides = array<i32>} : memref<16x48xf32, #tpu.memory_space<vmem>>, vector<16x48xf32>,
    return
  }
  func.func @transform_0(%arg0: i32, %arg1: i32) -> (i32, i32) {
    %c0_i32 = arith.constant 0 : i32
    %c0_i32_0 = arith.constant 0 : i32
    return %arg0, %c0_i32 : i32, i32
  }
  func.func @transform_1(%arg0: i32, %arg1: i32) -> (i32, i32) {
    %c0_i32 = arith.constant 0 : i32
    %c0_i32_0 = arith.constant 0 : i32
    return %c0_i32, %arg1 : i32, i32
  }
  func.func @transform_2(%arg0: i32, %arg1: i32) -> (i32, i32) {
    %c0_i32 = arith.constant 0 : i32
    %c0_i32_0 = arith.constant 0 : i32
    return %c0_i32, %arg1 : i32, i32
  }
  func.func @transform_3(%arg0: i32, %arg1: i32) -> (i32, i32) {
    %c0_i32 = arith.constant 0 : i32
    return %arg0, %arg1 : i32, i32
  }
}

</mosaic_0001>

<bundles_post_ra>
// kernel: _packed_linear.1
= control target key start
LH: loop header
LB: loop body
LE: loop exit
PB: predicated region body
PF: predicated region fallthrough
CT: control target
= control target key end

     0   :  { %8 = vsyncpa [#allocation3], 0  ;;  %s308_s0 = inlined_call_operand.hbm [shape: f32[16,32], index: 0, kind: input, shape index: {}]   ;;  %s309_s1 = inlined_call_operand.hbm [shape: bf16[32,48], index: 1, kind: input, shape index: {}]   ;;  %s310_s2 = inlined_call_operand.vmem [shape: f32[1,48], index: 2, kind: input, shape index: {}]   ;;  %s311_s3 = inlined_call_operand.hbm [shape: f32[16,48], index: 3, kind: output, shape index: {}]  }
   0x1   :  { %9 = vsyncpa [#allocation6], 0 }
   0x2   :  { %10 = vsyncpa [#allocation4], 0  ;;  %s234_s12 = smov [#allocation2]   ;;  %s162_s16 = scalar_lea.hbm %s308_s0, 256 }
   0x3   :  { %s16_s13 = sshll.u32 %s234_s12, 4  ;;  %p163_p0 = scmp.ne.s32.totalorder %s308_s0, %s162_s16  ;;  %s17_s13 = int_to_ptr.vmem [resolvable:$true] %s16_s13 }
   0x4   :  { %p166_p1 = scmp.lt.u32.totalorder %s162_s16, %s308_s0 }
   0x6   :  { %p168_p2 = pnand %p166_p1, %p163_p0 }
   0x8   :  { %171 = shalt.err (!%p168_p2)
}
   0x9   :  { %s172_s21 = scalar_lea.vmem %s17_s13, 256  ;;  %p177_p4 = scmp.lt.s32.totalorder %s17_s13, %s17_s13 }
   0xa   :  { %p173_p3 = scmp.ne.s32.totalorder %s17_s13, %s172_s21  ;;  %p178_p5 = scmp.lt.s32.totalorder %s172_s21, %s172_s21 }
   0xc   :  { %p179_p6 = por %p178_p5, %p177_p4 }
   0xe   :  { %p180_p7 = pnand %p179_p6, %p173_p3 }
  0x10   :  { %183 = shalt.err (!%p180_p7)
}
  0x11   :  { %s235_s22 = smov 128   ;;  %s236_s23 = smov 8  }
  0x12   :  { %22 = dma.hbm_to_vmem [thread:$0]  %s308_s0, 256, %s17_s13, [#allocation3], %s235_s22, %s235_s22, %s236_s23  }
  0x13   :  { %s237_s26 = smov [#allocation5]   ;;  %s184_s30 = scalar_lea.hbm %s309_s1, 256 }
  0x14   :  { %s28_s27 = sshll.u32 %s237_s26, 4  ;;  %p185_p8 = scmp.ne.s32.totalorder %s309_s1, %s184_s30  ;;  %s29_s27 = int_to_ptr.vmem [resolvable:$true] %s28_s27 }
  0x15   :  { %p188_p9 = scmp.lt.u32.totalorder %s184_s30, %s309_s1 }
  0x17   :  { %p190_p10 = pnand %p188_p9, %p185_p8 }
  0x19   :  { %193 = shalt.err (!%p190_p10)
}
  0x1a   :  { %s194_s8 = scalar_lea.vmem %s29_s27, 256  ;;  %p199_p12 = scmp.lt.s32.totalorder %s29_s27, %s29_s27 }
  0x1b   :  { %p195_p11 = scmp.ne.s32.totalorder %s29_s27, %s194_s8  ;;  %p200_p13 = scmp.lt.s32.totalorder %s194_s8, %s194_s8 }
  0x1d   :  { %p201_p0 = por %p200_p13, %p199_p12 }
  0x1f   :  { %p202_p1 = pnand %p201_p0, %p195_p11 }
  0x21   :  { %205 = shalt.err (!%p202_p1)
}
  0x22   :  { %s238_s0 = smov 64   ;;  %s239_s9 = smov 4  }
  0x23   :  { %34 = dma.hbm_to_vmem [thread:$0]  %s309_s1, 256, %s29_s27, [#allocation6], %s238_s0, %s238_s0, %s239_s9  }
  0x24   :  { %228 = dma.done.wait [#allocation3], 256  }
  0x25   :  { %229 = vsyncadd [#allocation3], 4294967040 }
  0x26   :  { %230 = dma.done.wait [#allocation6], 256  }
  0x27   :  { %231 = vsyncadd [#allocation6], 4294967040  ;;  %v240_v0 = vmov 0.0   ;;  %vm241_vm0 = vmmov 0   ;;  %v160_v1 = vld [vmem:[#allocation5] sm:$0xff]   ;;  %v161_v2 = vld [vmem:[#allocation5 + $0x8] sm:$0xff]  }
  0x28   :  { %143 = vmatprep.subr.bf16.mxu0 %v240_v0  ;;  %147 = vmatprep.mubr.msk.bf16.mxu0 %vm241_vm0, %v240_v0  ;;  %v44_v3 = vld [vmem:[#allocation2] sm:$0xff]  ;;  %v45_v4 = vld [vmem:[#allocation2 + $0x8] sm:$0xff]  ;;  %vm70_vm1 = vcmask 261120   ;;  %vm115_vm2 = vcmask 392192   ;;  %s242_s13 = smov [#allocation7]  }
  0x29   :  { %144 = vmatpush3.bf16.msra.mxu0 %v160_v1  ;;  %v46_v5 = vpack.c.bf16 %v45_v4, %v44_v3  ;;  %v136_v6 = vld [vmem:[%s310_s2] ss:$0 sm:$0xff]  ;;  %s123_s14 = sshll.u32 %s242_s13, 4  ;;  %s124_s14 = int_to_ptr.vmem [resolvable:$true] %s123_s14 }
  0x2a   :  { %145 = vmatprep.subr.bf16.mxu0 %v240_v0  ;;  %s206_s15 = scalar_lea.vmem %s124_s14, 256  ;;  %p211_p3 = scmp.lt.s32.totalorder %s124_s14, %s124_s14 }
  0x2b   :  { %p207_p2 = scmp.ne.s32.totalorder %s124_s14, %s206_s15  ;;  %p212_p4 = scmp.lt.s32.totalorder %s206_s15, %s206_s15 }
  0x2d   :  { %146 = vmatpush3.bf16.msra.mxu0 %v161_v2  ;;  %p213_p5 = por %p212_p4, %p211_p3 }
  0x2f   :  { %p214_p6 = pnand %p213_p5, %p207_p2 }
  0x30   :  { %148 = vmatmul.mubr.msk.bf16.vlgmr.msra.gmra.mrb[0].mxu0 %vm70_vm1, %v46_v5 }
 0x103   :  { %v108_v7 = vpop.f32.mrb[0].mxu0 }
 0x104   :  { %v109_v8 = vadd.f32 %v136_v6, %v108_v7  ;;  %v149_v9 = vpop.f32.mrb[1].mxu0 }
 0x105   :  { %v111_v10 = vpop.f32.mrb[2].mxu0 }
 0x106   :  { %v112_v11 = vadd.f32 %v136_v6, %v111_v10  ;;  %v150_v12 = vpop.f32.mrb[3].mxu0  ;;  %116 = vst.msk [vmem:[#allocation7] sm:$0xff] %vm115_vm2, %v109_v8 }
 0x108   :  { %117 = vst.msk [vmem:[#allocation7 + $0x8] sm:$0xff] %vm115_vm2, %v112_v11 }
 0x109   :  { %217 = shalt.err (!%p214_p6)
}
 0x10a   :  { %s218_s17 = scalar_lea.hbm %s311_s3, 256 }
 0x10b   :  { %p219_p7 = scmp.ne.s32.totalorder %s311_s3, %s218_s17  ;;  %p222_p8 = scmp.lt.u32.totalorder %s218_s17, %s311_s3 }
 0x10d   :  { %p224_p9 = pnand %p222_p8, %p219_p7 }
 0x10f   :  { %227 = shalt.err (!%p224_p9)
}
 0x110   :  { %129 = dma.vmem_to_hbm [thread:$0]  %s124_s14, 256, %s311_s3, [#allocation4], %s235_s22, %s235_s22, %s236_s23  }
 0x111   :  { %232 = dma.done.wait [#allocation4], 256  }
 0x112   :  { %233 = vsyncadd [#allocation4], 4294967040 }
 0x113   :  { %133 = vsyncpa [#allocation3], 1 }
 0x114   :  { %134 = vsyncpa [#allocation6], 1 }
 0x115   :  { %135 = vsyncpa [#allocation4], 1 }

</bundles_post_ra>
